<compile_context>
chip_gen: v5e
topology: v5e:2x2
jax: 0.10.0
libtpu: 0.0.40
codegen_flags: <defaults>
</compile_context>

<pallas_src>
import math
from functools import partial

import jax
import jax.numpy as jnp
from jax.experimental import pallas as pl
from jax.experimental.pallas import tpu as pltpu


def _block_compact_kernel(
    x_ref, w_ref, b_ref, o_ref, pooled_ref=None, *,
    block_size, seq_len, seq_tile, ragged_tile, compute_dtype,
):
    """One (batch, seq-tile) grid step: block-sum -> fused linear."""
    ts_out = seq_tile // block_size
    hidden = x_ref.shape[-1]
    s_tile = pl.program_id(1)

    def block_sum(masked):
        # block_size strided sublane loads + VPU adds (no pooling matrix, no MXU).
        acc = jnp.zeros((ts_out, hidden), jnp.float32)
        if masked:
            # Global row of element k of strided slice r is s_tile*ts + k*bs + r;
            # rows >= seq_len are (implicit) zero padding.  Mask kept (ts_out, 1).
            k_iota = jax.lax.broadcasted_iota(jnp.int32, (ts_out, 1), 0)
            base = s_tile * seq_tile + k_iota * block_size
        for r in range(block_size):
            v = x_ref[pl.ds(r, ts_out, stride=block_size), :].astype(jnp.float32)
            if masked:
                v = jnp.where(base + r < seq_len, v, 0.0)
            acc = acc + v
        return acc

    if ragged_tile is None:
        pooled = block_sum(False)
    else:
        # Only the statically-known last seq tile can be ragged; all other tiles
        # take the unmasked path (no per-tile mask cost).
        @pl.when(s_tile != ragged_tile)
        def _():
            pooled_ref[...] = block_sum(False)

        @pl.when(s_tile == ragged_tile)
        def _():
            pooled_ref[...] = block_sum(True)

        pooled = pooled_ref[...]

    # Single fused linear: W12 already contains w1 @ w2 and the 1/block_size scale,
    # b12 = b1 @ w2 + b2 (composed in f32 in the wrapper).  f32 MXU accumulation.
    y = jnp.dot(pooled.astype(compute_dtype), w_ref[...],
                preferred_element_type=jnp.float32) + b_ref[...]
    o_ref[...] = y.astype(o_ref.dtype)


def _vmem_capacity_bytes():
    cap = 64 << 20  # conservative fallback (v7x per-core); v5e/v6e report 128 MiB
    try:
        info = pltpu.get_tpu_info()
        cap = int(getattr(info, "vmem_capacity_bytes", cap))
    except Exception:
        pass
    return cap


def block_compactor_pallas(x, w1, b1, w2, b2, block_size,
                           *, compute_dtype=jnp.bfloat16, seq_tile=None):
    """BlockCompactor.forward in Pallas.  x: [B, S, H]; weights stored [in, out]."""
    B, S, H = x.shape
    n_blocks = -(-S // block_size)          # ceil
    S_out = n_blocks
    S_pad = n_blocks * block_size

    x_item = x.dtype.itemsize
    out_item = x_item
    w_item = 4 if compute_dtype == jnp.float32 else jnp.dtype(compute_dtype).itemsize

    # Keep ts_out a multiple of the sublane packing of the output dtype.
    rows_mult = {4: 8, 2: 16, 1: 32}.get(out_item, 8)
    unit = block_size * rows_mult

    vmem_cap = _vmem_capacity_bytes()

    if S_pad <= unit:
        # Tiny-sequence (toy) case: single tile; pad in the wrapper so the tile
        # matches the array exactly (avoids degenerate sub-unit partial blocks).
        if S_pad != S:
            x = jnp.concatenate([x, jnp.zeros((B, S_pad - S, H), x.dtype)], axis=1)
            S = S_pad            # harmless: needs_mask is False on this branch
        ts = S_pad
    elif seq_tile is not None:
        ts = max(unit, (min(seq_tile, S_pad) // unit) * unit)
    else:
        # Per-generation VMEM budget: the fused weight + bias + compiler headroom are
        # fixed; x/out pipeline buffers and f32 intermediates scale with the tile.
        budget = int(vmem_cap * 0.85)
        fixed = H * H * w_item + 2 * H * 4 + (4 << 20)
        per_row = 2.0 * H * x_item + (2.0 * out_item + 7 * 4) * H / block_size
        ts_cap = int(max(budget - fixed, 0) // max(per_row, 1.0))
        ts_target = 512 * block_size        # >=512 seq rows per tile keeps MXU/HBM fed
        ts = max(unit, (min(ts_target, ts_cap, S_pad) // unit) * unit)

    ts_out = ts // block_size
    n_tiles = -(-S_pad // ts)
    needs_mask = (n_tiles * ts != S)        # only the last tile can be ragged
    ragged_tile = (n_tiles - 1) if needs_mask else None

    # Fuse pre_pool/post_pool (no nonlinearity between them after the pool-first
    # rewrite) and fold the 1/block_size mean scale into the composed weight.
    hi = jax.lax.Precision.HIGHEST
    w1f = jnp.asarray(w1, jnp.float32)
    w2f = jnp.asarray(w2, jnp.float32)
    w12 = jnp.matmul(w1f, w2f, precision=hi) * (1.0 / block_size)
    b12 = jnp.matmul(jnp.asarray(b1, jnp.float32), w2f, precision=hi) \
        + jnp.asarray(b2, jnp.float32)
    if compute_dtype != jnp.float32:
        w12 = w12.astype(compute_dtype)
    b12 = b12.reshape(1, H)

    kernel = partial(
        _block_compact_kernel,
        block_size=block_size, seq_len=S, seq_tile=ts,
        ragged_tile=ragged_tile, compute_dtype=compute_dtype,
    )

    scratch_shapes = []
    if needs_mask:
        scratch_shapes.append(pltpu.VMEM((ts_out, H), jnp.float32))

    # Accounted VMEM: double-buffered x/out tiles, single-buffered (whole-array VMEM)
    # weight/bias, f32 intermediates (+ pooled scratch when masking), plus headroom.
    n_interm = 7 if needs_mask else 6
    accounted = (2 * ts * H * x_item + 2 * ts_out * H * out_item
                 + H * H * w_item + H * 4 + n_interm * ts_out * H * 4)
    vmem_limit = int(max(accounted + (4 << 20), 16 << 20))
    vmem_limit = int(min(vmem_limit, vmem_cap))

    return pl.pallas_call(
        kernel,
        out_shape=jax.ShapeDtypeStruct((B, S_out, H), x.dtype),
        grid=(B, n_tiles),
        in_specs=[
            pl.BlockSpec((None, ts, H), lambda b, s: (b, s, 0)),      # x tile (pipelined)
            pl.BlockSpec(memory_space=pltpu.MemorySpace.VMEM),        # W12 resident, single-buffered
            pl.BlockSpec(memory_space=pltpu.MemorySpace.VMEM),        # b12 resident
        ],
        out_specs=pl.BlockSpec((None, ts_out, H), lambda b, s: (b, s, 0)),
        scratch_shapes=scratch_shapes,
        compiler_params=pltpu.CompilerParams(
            dimension_semantics=("parallel", "parallel"),
            vmem_limit_bytes=vmem_limit,
        ),
    )(x, w12, b12)


class MemoryCompactorPallas:
    """JAX/Pallas port of MemoryCompactor with compaction_strategy='block'."""

    def __init__(self, hidden_size, threshold=8192, block_size=4,
                 compute_dtype=jnp.bfloat16, key=None):
        self.hidden_size = hidden_size
        self.threshold = threshold
        self.block_size = block_size
        self.compute_dtype = compute_dtype
        if key is None:
            key = jax.random.PRNGKey(0)
        k1, k2, k3, k4 = jax.random.split(key, 4)
        bound = 1.0 / math.sqrt(hidden_size)
        # nn.Linear default init: U(-1/sqrt(fan_in), ...); weights stored [in, out].
        self.w1 = jax.random.uniform(k1, (hidden_size, hidden_size), jnp.float32, -bound, bound)
        self.b1 = jax.random.uniform(k2, (hidden_size,), jnp.float32, -bound, bound)
        self.w2 = jax.random.uniform(k3, (hidden_size, hidden_size), jnp.float32, -bound, bound)
        self.b2 = jax.random.uniform(k4, (hidden_size,), jnp.float32, -bound, bound)

    def __call__(self, x):
        # MemoryCompactor.forward also recurses over tuple/list/dict inputs (host-side).
        if isinstance(x, (tuple, list)):
            out = [self(item) for item in x]
            return tuple(out) if isinstance(x, tuple) else out
        if isinstance(x, dict):
            return {k: self(v) for k, v in x.items()}
        if x.shape[1] < self.threshold:
            return x
        return block_compactor_pallas(
            x, self.w1, self.b1, self.w2, self.b2, self.block_size,
            compute_dtype=self.compute_dtype,
        )


def _reference(x, w1, b1, w2, b2, block_size):
    """Pure-JAX reference of BlockCompactor (same op order as PyTorch)."""
    B, S, H = x.shape
    if S % block_size != 0:
        pad = block_size - S % block_size
        x = jnp.concatenate([x, jnp.zeros((B, pad, H), x.dtype)], axis=1)
        S += pad
    y = x @ w1 + b1
    y = y.reshape(B, S // block_size, block_size, H).mean(axis=2)
    return y @ w2 + b2


if __name__ == "__main__":
    key = jax.random.PRNGKey(0)
    k_x, k_x2, k_x3, k_params = jax.random.split(key, 4)

    # --- Test 1: toy shape, f32 path, single tile ------------------------------------
    B, S, H = 2, 8, 32
    x = jax.random.normal(k_x, (B, S, H), dtype=jnp.float32)
    compactor = MemoryCompactorPallas(hidden_size=H, threshold=8, block_size=4,
                                      compute_dtype=jnp.float32, key=k_params)
    out = jax.block_until_ready(compactor(x))
    expected = _reference(x, compactor.w1, compactor.b1, compactor.w2,
                          compactor.b2, compactor.block_size)
    assert out.shape == (B, S // 4, H), out.shape
    assert jnp.allclose(out, expected, atol=5e-3, rtol=5e-3)

    # Below-threshold passthrough + pytree recursion (pure Python path).
    small = jax.random.normal(k_x2, (B, 4, H), dtype=jnp.float32)
    assert compactor({"mem": small})["mem"] is small

    # --- Test 2: multi-tile grid, ragged tail (S % block_size != 0), bf16 MXU --------
    B2, S2, H2 = 2, 70, 128
    x2 = jax.random.normal(k_x2, (B2, S2, H2), dtype=jnp.float32)
    comp2 = MemoryCompactorPallas(hidden_size=H2, threshold=8, block_size=4,
                                  compute_dtype=jnp.bfloat16, key=jax.random.PRNGKey(1))
    out2 = jax.block_until_ready(
        block_compactor_pallas(x2, comp2.w1, comp2.b1, comp2.w2, comp2.b2,
                               comp2.block_size, compute_dtype=jnp.bfloat16,
                               seq_tile=32))
    exp2 = _reference(x2, comp2.w1, comp2.b1, comp2.w2, comp2.b2, comp2.block_size)
    assert out2.shape == exp2.shape, (out2.shape, exp2.shape)
    assert jnp.allclose(out2, exp2, atol=5e-2, rtol=5e-2)

    # --- Test 3: automatic (VMEM-budget) tile selection + ragged last tile -----------
    B3, S3, H3 = 1, 4099, 128
    x3 = jax.random.normal(k_x3, (B3, S3, H3), dtype=jnp.float32)
    comp3 = MemoryCompactorPallas(hidden_size=H3, threshold=8, block_size=4,
                                  compute_dtype=jnp.bfloat16, key=jax.random.PRNGKey(2))
    out3 = jax.block_until_ready(comp3(x3))
    exp3 = _reference(x3, comp3.w1, comp3.b1, comp3.w2, comp3.b2, comp3.block_size)
    assert out3.shape == exp3.shape, (out3.shape, exp3.shape)
    assert jnp.allclose(out3, exp3, atol=5e-2, rtol=5e-2)

    print("KERNEL_OK")
</pallas_src>

<mosaic_0001>
module attributes {stable_mosaic.version = 11 : i64} {
  func.func @_block_compact_kernel(%arg0: i32, %arg1: i32, %arg2: memref<1x8x32xf32, #tpu.memory_space<vmem>>, %arg3: memref<32x32xf32, #tpu.memory_space<vmem>>, %arg4: memref<1x32xf32, #tpu.memory_space<vmem>>, %arg5: memref<1x2x32xf32, #tpu.memory_space<vmem>>) attributes {dimension_semantics = [#tpu.dimension_semantics<parallel>, #tpu.dimension_semantics<parallel>], iteration_bounds = array<i64: 2, 1>, scalar_prefetch = 0 : i64, scratch_operands = 0 : i64, tpu.core_type = #tpu.core_type<tc>, window_params = [{transform_indices = @transform_0, window_bounds = array<i64: 1, 8, 32>}, {pipeline_mode = #tpu.pipeline_mode<synchronous>, transform_indices = @transform_1, window_bounds = array<i64: 32, 32>}, {pipeline_mode = #tpu.pipeline_mode<synchronous>, transform_indices = @transform_2, window_bounds = array<i64: 1, 32>}, {transform_indices = @transform_3, window_bounds = array<i64: 1, 2, 32>}]} {
    %cst = arith.constant 0.000000e+00 : f32
    %0 = vector.broadcast %cst : f32 to vector<2x32xf32>
    %c0 = arith.constant 0 : index
    %c0_0 = arith.constant 0 : index
    %c0_1 = arith.constant 0 : index
    %1 = tpu.strided_load %arg2[%c0, %c0_0, %c0_1] {strides = array<i32: 1, 4, 1>} : memref<1x8x32xf32, #tpu.memory_space<vmem>>, vector<1x2x32xf32>
    %2 = vector.shape_cast %1 : vector<1x2x32xf32> to vector<2x32xf32>
    %3 = arith.addf %0, %2 : vector<2x32xf32>
    %c0_2 = arith.constant 0 : index
    %c1 = arith.constant 1 : index
    %c0_3 = arith.constant 0 : index
    %4 = tpu.strided_load %arg2[%c0_2, %c1, %c0_3] {strides = array<i32: 1, 4, 1>} : memref<1x8x32xf32, #tpu.memory_space<vmem>>, vector<1x2x32xf32>
    %5 = vector.shape_cast %4 : vector<1x2x32xf32> to vector<2x32xf32>
    %6 = arith.addf %3, %5 : vector<2x32xf32>
    %c0_4 = arith.constant 0 : index
    %c2 = arith.constant 2 : index
    %c0_5 = arith.constant 0 : index
    %7 = tpu.strided_load %arg2[%c0_4, %c2, %c0_5] {strides = array<i32: 1, 4, 1>} : memref<1x8x32xf32, #tpu.memory_space<vmem>>, vector<1x2x32xf32>
    %8 = vector.shape_cast %7 : vector<1x2x32xf32> to vector<2x32xf32>
    %9 = arith.addf %6, %8 : vector<2x32xf32>
    %c0_6 = arith.constant 0 : index
    %c3 = arith.constant 3 : index
    %c0_7 = arith.constant 0 : index
    %10 = tpu.strided_load %arg2[%c0_6, %c3, %c0_7] {strides = array<i32: 1, 4, 1>} : memref<1x8x32xf32, #tpu.memory_space<vmem>>, vector<1x2x32xf32>
    %11 = vector.shape_cast %10 : vector<1x2x32xf32> to vector<2x32xf32>
    %12 = arith.addf %9, %11 : vector<2x32xf32>
    %c0_8 = arith.constant 0 : index
    %c0_9 = arith.constant 0 : index
    %13 = vector.load %arg3[%c0_8, %c0_9] : memref<32x32xf32, #tpu.memory_space<vmem>>, vector<32x32xf32>
    %cst_10 = arith.constant dense<0.000000e+00> : vector<2x32xf32>
    %14 = tpu.matmul %12, %13, %cst_10 {dimension_numbers = #tpu.dot_dimension_numbers<[1], [0], [0], [1], [0, 0, 1, 1], [], []>} : vector<2x32xf32>, vector<32x32xf32>, vector<2x32xf32> -> vector<2x32xf32>
    %c0_11 = arith.constant 0 : index
    %c0_12 = arith.constant 0 : index
    %15 = vector.load %arg4[%c0_11, %c0_12] : memref<1x32xf32, #tpu.memory_space<vmem>>, vector<1x32xf32>
    %16 = vector.broadcast %15 : vector<1x32xf32> to vector<2x32xf32>
    %17 = arith.addf %14, %16 : vector<2x32xf32>
    %c0_13 = arith.constant 0 : index
    %c0_14 = arith.constant 0 : index
    %c0_15 = arith.constant 0 : index
    %18 = vector.load %arg5[%c0_13, %c0_14, %c0_15] : memref<1x2x32xf32, #tpu.memory_space<vmem>>, vector<1x2x32xf32>
    %19 = vector.shape_cast %18 : vector<1x2x32xf32> to vector<2x32xf32>
    %20 = vector.shape_cast %17 : vector<2x32xf32> to vector<1x2x32xf32>
    tpu.vector_store %arg5[%c0_13, %c0_14, %c0_15], %20 {strides = array<i32>} : memref<1x2x32xf32, #tpu.memory_space<vmem>>, vector<1x2x32xf32>,
    return
  }
  func.func @transform_0(%arg0: i32, %arg1: i32) -> (i32, i32, i32) {
    %c0_i32 = arith.constant 0 : i32
    %c0_i32_0 = arith.constant 0 : i32
    return %arg0, %arg1, %c0_i32 : i32, i32, i32
  }
  func.func @transform_1(%arg0: i32, %arg1: i32) -> (i32, i32) {
    %c0_i32 = arith.constant 0 : i32
    %c0_i32_0 = arith.constant 0 : i32
    %c0_i32_1 = arith.constant 0 : i32
    return %c0_i32, %c0_i32_0 : i32, i32
  }
  func.func @transform_2(%arg0: i32, %arg1: i32) -> (i32, i32) {
    %c0_i32 = arith.constant 0 : i32
    %c0_i32_0 = arith.constant 0 : i32
    %c0_i32_1 = arith.constant 0 : i32
    return %c0_i32, %c0_i32_0 : i32, i32
  }
  func.func @transform_3(%arg0: i32, %arg1: i32) -> (i32, i32, i32) {
    %c0_i32 = arith.constant 0 : i32
    %c0_i32_0 = arith.constant 0 : i32
    return %arg0, %arg1, %c0_i32 : i32, i32, i32
  }
}

</mosaic_0001>

<bundles_post_ra>
// kernel: tpu_custom_call.1
= control target key start
LH: loop header
LB: loop body
LE: loop exit
PB: predicated region body
PF: predicated region fallthrough
CT: control target
= control target key end

     0   :  { %8 = vsyncpa [#allocation3], 0  ;;  %s787_s0 = inlined_call_operand.hbm [shape: f32[2,8,32], index: 0, kind: input, shape index: {}]   ;;  %s788_s1 = inlined_call_operand.hbm [shape: f32[32,32], index: 1, kind: input, shape index: {}]   ;;  %s789_s2 = inlined_call_operand.vmem [shape: f32[1,32], index: 2, kind: input, shape index: {}]   ;;  %s790_s3 = inlined_call_operand.hbm [shape: f32[2,2,32], index: 3, kind: output, shape index: {}]  }
   0x1   :  { %10 = vsyncpa [#allocation3 + $0x1], 0 }
   0x2   :  { %11 = vsyncpa [#allocation6], 0 }
   0x3   :  { %12 = vsyncpa [#allocation4], 0 }
   0x4   :  { %14 = vsyncpa [#allocation4 + $0x1], 0  ;;  %s640_s12 = smov 0   ;;  %s642_s13 = smov 0  }
   0x5   :  { %s644_s14 = smov 0   ;;  %s646_s15 = smov 0  }
   0x6   :  { %s648_s16 = smov 0   ;;  %s650_s17 = smov 0  }
   0x7 LB: > { %s374_s18 = sadd.s32 4294967295, %s615_s17   ;;  %p376_p0 = scmp.ge.s32.totalorder %s615_s17, 1  ;;  %s615_s17 = sphi %s650_s17, %s20_s17   ;;  %s611_s16 = sphi %s648_s16, %s801_s16   ;;  %s607_s15 = sphi %s646_s15, %s800_s15   ;;  %s603_s14 = sphi %s644_s14, %s799_s14   ;;  %s599_s13 = sphi %s642_s13, %s798_s13   ;;  %s595_s12 = sphi %s640_s12, %s797_s12  }
   0x8   : > { %p672_p1 = scmp.eq.s32.totalorder %s374_s18, 0  ;;  %p135_p2 = scmp.lt.s32.totalorder %s615_s17, 3 }
   0x9   : > { %s146_s22 = sshll.u32 %s788_s1, 4  ;;  %s617_s24 = smov [#allocation5]   ;;  %s147_s22 = int_to_ptr.hbm [resolvable:$true] %s146_s22 }
   0xa   : > { %p680_p3 = pnand %p376_p0, %p135_p2  ;;  %s148_s25 = sshll.u32 %s617_s24, 4  ;;  %s149_s25 = int_to_ptr.vmem [resolvable:$true] %s148_s25 }
   0xb   : > { %p378_p6 = scmp.ge.s32.totalorder %s615_s17, 2  ;;  %s618_s26 = smov 128  }
   0xc   : > { %p401_p4 = pneg %p680_p3  ;;  %s619_s27 = smov 8  }
   0xd   : > { %s375_s28 = sadd.s32 4294967294, %s615_s17   ;;  %s32_s29 = sadd.s32 1, %s611_s16 }
   0xe   : > { %p402_p5 = pnand %p401_p4, %p672_p1  ;;  %s41_s30 = sadd.s32 1, %s603_s14 }
   0xf   : > { %p34_p7 = scmp.ge.s32.totalorder %s32_s29, 2  ;;  %p48_p8 = scmp.ne.s32.totalorder %s603_s14, %s599_s13 }
  0x10   : > { %404 = dma.hbm_to_vmem [thread:$0]  (!%p402_p5), %s147_s22, 512, %s149_s25, [#allocation6], %s618_s26, %s618_s26, %s619_s27  }
  0x11   : > { %p49_p9 = scmp.eq.s32.totalorder %s615_s17, 0  ;;  %p54_p10 = scmp.ne.s32.totalorder %s599_s13, %s595_s12 }
  0x12   : > { %s803_s29 = smov (%p34_p7, %s32_s29), 0  ;;  %p122_p13 = scmp.eq.s32.totalorder %s374_s18, 1 }
  0x13   : > { %p699_p11 = por %p49_p9, %p48_p8  ;;  %p705_p12 = por %p672_p1, %p54_p10 }
  0x14   : > { %s36_s6 = ssub.s32 %s611_s16, %s803_s29  ;;  %p128_p2 = scmp.eq.s32.totalorder %s375_s28, 1 }
  0x15   : > { %p39_p0 = scmp.eq.s32.totalorder %s36_s6, 0  ;;  %p711_p4 = por %p122_p13, %p48_p8 }
  0x16   : > { %p414_p5 = scmp.lt.s32.totalorder %s615_s17, 2  ;;  %p719_p7 = por %p128_p2, %p54_p10 }
  0x17   : > { %s717_s8 = scalar_select %p39_p0, %s603_s14, %s41_s30  }
  0x18   : > { %s165_s10 = sand.u32 1, %s603_s14   ;;  %s380_s20 = sshll.u32 %s611_s16, 3 }
  0x19   : > { %s379_s11 = sshll.u32 %s165_s10, 3  ;;  %s174_s18 = scalar_lea.hbm %s787_s0, %s380_s20 }
  0x1a   : > { %s169_s24 = scalar_lea.vmem [#allocation2], %s379_s11  ;;  %s176_s26 = sshll.u32 %s174_s18, 4  ;;  %s177_s26 = int_to_ptr.hbm [resolvable:$true] %s176_s26 }
  0x1b   : > { %s178_s25 = sshll.u32 %s169_s24, 4  ;;  %p406_p8 = pnand %p414_p5, %p699_p11  ;;  %s179_s25 = int_to_ptr.vmem [resolvable:$true] %s178_s25 }
  0x1c   : > { %s166_s27 = scalar_lea.sflag [#allocation3], %s165_s10  ;;  %187 = sbr.rel (%p680_p3) target bundleno = 176 (0xb0), region = 32 }
  0x1d   : > { %408 = dma.hbm_to_vmem [thread:$0]  (!%p406_p8), %s177_s26, 128, %s179_s25, %s166_s27  }
  0x1e   : > { %s733_s28 = sand.u32 (!%p680_p3), 1, %s599_s13  }
  0x1f   : > { %s382_s30 = sshll.u32 (!%p680_p3), %s733_s28, 3  ;;  %s190_s6 = scalar_lea.sflag (!%p680_p3), [#allocation3], %s733_s28 }
  0x20   : > { %s193_s11 = scalar_lea.vmem (!%p680_p3), [#allocation2], %s382_s30 }
  0x21   : > { %582 = dma.done.wait (%p705_p12), %s190_s6, 128  }
  0x22   : > { %584 = vsyncadd (%p705_p12), %s190_s6, 4294967168 }
  0x23   : > { %586 = dma.done.wait (%p672_p1), [#allocation6], 512  }
  0x24   : > { %588 = vsyncadd (%p672_p1), [#allocation6], 4294966784  ;;  %v236_v0 = vld [vmem:[#allocation5 + $0x18] sm:$0xff]  ;;  %v235_v1 = vld [vmem:[#allocation5 + $0x10] sm:$0xff]  ;;  %vm241_vm0 = vcmask 261120   ;;  %s384_s19 = sshll.u32 %s733_s28, 1 }
  0x25   : > { %257 = vmatpush.msra.mxu0 %v236_v0  ;;  %v234_v2 = vld [vmem:[#allocation5 + $0x8] sm:$0xff]  ;;  %v222_v3 = vld [vmem:[%s193_s11] ss:$4 sm:$0x3]  ;;  %v233_v7 = vld [vmem:[#allocation5] sm:$0xff]  ;;  %s390_s23 = sshll.u32 %s607_s15, 1 }
  0x26   : > { %v385_v4 = vld [vmem:[%s193_s11 + $0x1] ss:$4 sm:$0x3]  ;;  %v386_v5 = vld [vmem:[%s193_s11 + $0x2] ss:$4 sm:$0x3]  ;;  %s279_s10 = scalar_lea.hbm %s790_s3, %s390_s23 }
  0x27   : > { %258 = vmatpush.msra.mxu0 %v235_v1  ;;  %v226_v6 = vadd.f32 %v385_v4, %v222_v3  ;;  %v387_v8 = vld [vmem:[%s193_s11 + $0x3] ss:$4 sm:$0x3]  ;;  %v468_v11 = vld [vmem:[%s789_s2] ss:$0 sm:$0xff]  ;;  %s221_s22 = scalar_lea.vmem [#allocation7], %s384_s19 }
  0x28   : > { %s281_s18 = sshll.u32 %s221_s22, 4  ;;  %s283_s24 = sshll.u32 %s279_s10, 4  ;;  %vm265_vm1 = vcmask 254976   ;;  %s282_s18 = int_to_ptr.vmem [resolvable:$true] %s281_s18  ;;  %s284_s24 = int_to_ptr.hbm [resolvable:$true] %s283_s24 }
  0x29   : > { %259 = vmatpush.msra.mxu0 %v234_v2  ;;  %v229_v9 = vadd.f32 %v386_v5, %v226_v6  ;;  %s268_s25 = scalar_lea.sflag [#allocation4], %s733_s28  ;;  %s543_s15 = sshra.s32 %s284_s24, 4  ;;  %s544_s15 = int_to_ptr.hbm [resolvable:$true] %s543_s15 }
  0x2a   : > { %s545_s26 = scalar_lea.hbm %s544_s15, 2  ;;  %s549_s6 = scalar_lea.hbm %s790_s3, 4 }
  0x2b   : > { %260 = vmatpush.msra.mxu0 %v233_v7  ;;  %v232_v10 = vadd.f32 %v387_v8, %v229_v9  ;;  %p546_p1 = scmp.ne.s32.totalorder %s544_s15, %s545_s26  ;;  %p550_p10 = scmp.lt.s32.totalorder %s544_s15, %s790_s3 }
  0x2c   : > { %p551_p11 = scmp.lt.s32.totalorder %s549_s6, %s545_s26 }
  0x2d   : > { %388 = vmatmul.msk.f32.vlgmr.msra.gmra.mxu0 %vm241_vm0, %v232_v10  ;;  %p547_p3 = pnand %p546_p1, %p711_p4 }
  0x2e   : > { %p552_p12 = por %p551_p11, %p550_p10 }
  0x2f   : > { %p548_p9 = pneg %p547_p3 }
  0x31   : > { %p553_p13 = pnand %p552_p12, %p548_p9 }
  0xaa   : > { %v262_v12 = vpop.f32.mrf.mxu0 }
  0xab   : > { %v263_v13 = vadd.f32 %v468_v11, %v262_v12 }
  0xad   : > { %266 = vst.msk [vmem:[%s221_s22] sm:$0x3] %vm265_vm1, %v263_v13 }
  0xae   : > { %556 = shalt.err (!%p553_p13)
}
  0xaf   : > { %399 = dma.vmem_to_hbm [thread:$0]  (%p711_p4), %s282_s18, 32, %s284_s24, %s268_s25  }
  0xb0 PF: > { %s295_s28 = sand.u32 1, %s595_s12   ;;  %p410_p0 = pnand %p378_p6, %p719_p7 }
  0xb1   : > { %s296_s23 = scalar_lea.sflag [#allocation4], %s295_s28 }
  0xb2   : > { %p411_p2 = pneg %p410_p0 }
  0xb4   : > { %590 = dma.done.wait (%p411_p2), %s296_s23, 32  }
  0xb5   : > { %592 = vsyncadd (%p411_p2), %s296_s23, 4294967264  ;;  %s20_s17 = sadd.s32 1, %s615_s17   ;;  %s797_s12 = smov %s599_s13 }
  0xb6   : > { %p17_p5 = scmp.ge.s32.totalorder %s20_s17, 4   ;;  %s798_s13 = smov %s603_s14 }
  0xb7   : > { %s799_s14 = smov %s717_s8  ;;  %s800_s15 = smov %s611_s16 }
  0xb8   : > { %s801_s16 = smov %s803_s29  ;;  %19 = sbr.rel (!%p17_p5) target bundleno = 7 (0x7), region = 84 }
  0xbd   :  { %302 = vsyncpa [#allocation3], 1 }
  0xbe   :  { %304 = vsyncpa [#allocation3 + $0x1], 1 }
  0xbf   :  { %305 = vsyncpa [#allocation6], 1 }
  0xc0   :  { %306 = vsyncpa [#allocation4], 1 }
  0xc1   :  { %308 = vsyncpa [#allocation4 + $0x1], 1 }

</bundles_post_ra>
